<compile_context>
chip_gen: v7x
topology: tpu7x:2x2x1
jax: 0.10.0
libtpu: 0.0.40
codegen_flags: <defaults>
</compile_context>

<pallas_src>
import functools

import jax
import jax.numpy as jnp
from jax.experimental import pallas as pl
from jax.experimental.pallas import tpu as pltpu


def _disentanglement_kernel(logits_ref, labels_ref, out_ref, *,
                            tile_rows, total_rows, mask_rows):
    x = logits_ref[...].astype(jnp.float32)   # (tile_rows, V)
    y = labels_ref[...].astype(jnp.float32)   # (tile_rows, V)

    if mask_rows:
        # Only the last tile can be ragged; statically enabled only when
        # rows % tile_rows != 0.  Sanitize the padded rows before the logs
        # (Pallas's implicit partial-block padding is unspecified data) and
        # zero their contribution afterwards.
        tile_idx = pl.program_id(0) * pl.num_programs(1) + pl.program_id(1)
        row_ids = tile_idx * tile_rows + jax.lax.broadcasted_iota(
            jnp.int32, (tile_rows, 1), 0)
        valid = row_ids < total_rows
        x = jnp.where(valid, x, 0.0)
        y = jnp.where(valid, y, 0.5)

    # Numerically stable softmax along the last (lane) axis.
    m = jnp.max(x, axis=-1, keepdims=True)
    e = jnp.exp(x - m)
    denom = jnp.sum(e, axis=-1, keepdims=True)
    p = e * pl.reciprocal(denom, approx=True)   # EUP slot; ~1e-4 rel error

    # res = -p*log(y) - (1-p)*log(1-y)
    res = -p * jnp.log(y) - (1.0 - p) * jnp.log(1.0 - y)

    if mask_rows:
        res = jnp.where(valid, res, 0.0)

    # Fold sublane groups with plain VPU adds, keep the lane axis un-reduced.
    v = res.shape[-1]
    tile_sum = jnp.sum(res.reshape(tile_rows // 8, 8, v), axis=0)   # (8, V)

    # Resident accumulator: same output block for every step of the trailing
    # ("arbitrary") grid axis; written back to HBM once per core-split.
    @pl.when(pl.program_id(1) == 0)
    def _():
        out_ref[...] = jnp.zeros_like(out_ref)

    out_ref[...] += tile_sum


def _vmem_capacity_bytes():
    try:
        return int(pltpu.get_tpu_info().vmem_capacity_bytes)
    except Exception:
        return 64 * 1024 * 1024   # conservative fallback (v7x-sized)


def _choose_tile_rows(V, in_itemsizes, rows, sublane, vmem_cap):
    # Per-grid-step working set (bytes):
    #   inputs : each input double-buffered by the pipeline -> 2 * t * V * itemsize
    #   temps  : ~4 live f32 (t, V) arrays inside the kernel
    #            (upcast logits, upcast labels, exp/p, res)
    in_per_row = sum(2 * V * s for s in in_itemsizes)
    tmp_per_row = 4 * V * 4
    per_row = in_per_row + tmp_per_row

    budget = min(int(0.40 * vmem_cap), 48 * 1024 * 1024)
    if sublane * per_row > budget:
        # TODO(synk): for huge vocabularies, tile V as a second grid axis with
        # a carried (m, l) online-softmax accumulator instead of full-V blocks.
        raise ValueError(
            f"V={V} is too large for full-V row tiles within the VMEM budget "
            f"({budget} bytes); V-tiling is not implemented.")

    t = budget // per_row
    rows_rounded = ((rows + sublane - 1) // sublane) * sublane
    t = min(int(t), 4096, rows_rounded)   # no point tiling larger than the data
    t = max(sublane, (t // sublane) * sublane)
    return t


def disentanglement_loss(logits, dis_labels, *, tile_rows=None):
    """logits, dis_labels: [B, S, V] -> scalar f32 loss (matches res.sum())."""
    B, S, V = logits.shape
    rows = B * S

    logits2d = logits.reshape(rows, V)
    labels2d = dis_labels.reshape(rows, V)

    in_itemsizes = (logits2d.dtype.itemsize, labels2d.dtype.itemsize)
    # Native sublane packing: 8 rows for 32-bit, 16 for bf16, 32 for int8/fp8.
    sublane = max(8, *(32 // s for s in in_itemsizes))
    vmem_cap = _vmem_capacity_bytes()

    if tile_rows is None:
        tile_rows = _choose_tile_rows(V, in_itemsizes, rows, sublane, vmem_cap)
    if tile_rows % sublane != 0:
        raise ValueError(f"tile_rows must be a multiple of {sublane}")

    num_tiles = pl.cdiv(rows, tile_rows)
    mask_rows = (rows % tile_rows) != 0   # no HBM padding; mask in-kernel

    # Split the tile range across a leading "parallel" grid axis so both v7x
    # TensorCores get work; each split owns its own resident accumulator.
    n_split = 2 if (num_tiles >= 2 and num_tiles % 2 == 0) else 1
    tiles_per_split = num_tiles // n_split

    kernel = functools.partial(
        _disentanglement_kernel,
        tile_rows=tile_rows,
        total_rows=rows,
        mask_rows=mask_rows,
    )

    bytes_accessed = int(rows * V * sum(in_itemsizes) + n_split * 8 * V * 4)
    cost = pl.CostEstimate(
        flops=int(10 * rows * V),
        transcendentals=int(3 * rows * V),   # exp, log(y), log(1-y)
        bytes_accessed=bytes_accessed,
    )

    vmem_limit = min(int(0.80 * vmem_cap), 100 * 1024 * 1024)

    def in_map(c, i):
        return (c * tiles_per_split + i, 0)

    partials = pl.pallas_call(
        kernel,
        out_shape=jax.ShapeDtypeStruct((n_split * 8, V), jnp.float32),
        grid_spec=pltpu.PrefetchScalarGridSpec(
            num_scalar_prefetch=0,
            grid=(n_split, tiles_per_split),
            in_specs=[
                pl.BlockSpec((tile_rows, V), in_map),
                pl.BlockSpec((tile_rows, V), in_map),
            ],
            out_specs=pl.BlockSpec((8, V), lambda c, i: (c, 0)),
        ),
        compiler_params=pltpu.CompilerParams(
            dimension_semantics=("parallel", "arbitrary"),
            vmem_limit_bytes=vmem_limit,
        ),
        cost_estimate=cost,
    )(logits2d, labels2d)

    # Single cross-lane/row reduction of the tiny partial-sum tensor.
    return jnp.sum(partials)


def _reference_loss(logits, dis_labels):
    p = jax.nn.softmax(logits.astype(jnp.float32), axis=-1)
    y = dis_labels.astype(jnp.float32)
    res = -p * jnp.log(y) - (1.0 - p) * jnp.log(1.0 - y)
    return jnp.sum(res)


def _check(logits, dis_labels, **kwargs):
    loss = jax.block_until_ready(disentanglement_loss(logits, dis_labels, **kwargs))
    ref = _reference_loss(logits, dis_labels)
    assert jnp.allclose(loss, ref, rtol=1e-4, atol=1e-3), (loss, ref, kwargs)


if __name__ == "__main__":
    key = jax.random.PRNGKey(0)
    k1, k2, k3, k4, k5, k6 = jax.random.split(key, 6)
    V = 128

    # 1) Base case: rows divisible, default tiling (single tile).
    logits = jax.random.normal(k1, (2, 8, V), dtype=jnp.float32)
    labels = jax.random.uniform(k2, (2, 8, V), dtype=jnp.float32,
                                minval=0.01, maxval=0.99)
    _check(logits, labels)

    # 2) Ragged rows (B*S = 15), default tiling: exercises the in-kernel
    #    sanitize + mask path with no HBM padding.
    logits_r = jax.random.normal(k3, (3, 5, V), dtype=jnp.float32)
    labels_r = jax.random.uniform(k4, (3, 5, V), dtype=jnp.float32,
                                  minval=0.01, maxval=0.99)
    _check(logits_r, labels_r)

    # 3) Multi-tile + 2-way core split + resident accumulators
    #    (rows=256, tile_rows=64 -> grid=(2, 2)).
    logits_m = jax.random.normal(k5, (4, 64, V), dtype=jnp.float32)
    labels_m = jax.random.uniform(k6, (4, 64, V), dtype=jnp.float32,
                                  minval=0.01, maxval=0.99)
    _check(logits_m, labels_m, tile_rows=64)

    # 4) Ragged + 2-way split (rows=15, tile_rows=8 -> grid=(2, 1), last
    #    tile partially out of range).
    _check(logits_r, labels_r, tile_rows=8)

    # 5) bfloat16 inputs: exercises the 16-row sublane alignment + in-kernel
    #    f32 upcast (halves HBM traffic for callers that can use it).
    logits_b = jax.random.normal(k1, (2, 16, V), dtype=jnp.bfloat16)
    labels_b = jax.random.uniform(k2, (2, 16, V), dtype=jnp.bfloat16,
                                  minval=0.01, maxval=0.99)
    _check(logits_b, labels_b)

    print("KERNEL_OK")
</pallas_src>

<mosaic_0001>
module attributes {stable_mosaic.version = 11 : i64} {
  func.func @_disentanglement_kernel(%arg0: i32, %arg1: i32, %arg2: memref<16x128xf32, #tpu.memory_space<vmem>>, %arg3: memref<16x128xf32, #tpu.memory_space<vmem>>, %arg4: memref<8x128xf32, #tpu.memory_space<vmem>>) attributes {dimension_semantics = [#tpu.dimension_semantics<parallel>, #tpu.dimension_semantics<arbitrary>], iteration_bounds = array<i64: 1, 1>, scalar_prefetch = 0 : i64, scratch_operands = 0 : i64, tpu.core_type = #tpu.core_type<tc>, window_params = [{transform_indices = @transform_0, window_bounds = array<i64: 16, 128>}, {transform_indices = @transform_1, window_bounds = array<i64: 16, 128>}, {transform_indices = @transform_2, window_bounds = array<i64: 8, 128>}]} {
    %c0 = arith.constant 0 : index
    %c0_0 = arith.constant 0 : index
    %0 = vector.load %arg2[%c0, %c0_0] : memref<16x128xf32, #tpu.memory_space<vmem>>, vector<16x128xf32>
    %c0_1 = arith.constant 0 : index
    %c0_2 = arith.constant 0 : index
    %1 = vector.load %arg3[%c0_1, %c0_2] : memref<16x128xf32, #tpu.memory_space<vmem>>, vector<16x128xf32>
    %cst = arith.constant dense<0xFF800000> : vector<16xf32>
    %2 = vector.multi_reduction <maximumf>, %0, %cst [1] : vector<16x128xf32> to vector<16xf32>
    %3 = vector.shape_cast %2 : vector<16xf32> to vector<16x1xf32>
    %4 = vector.broadcast %3 : vector<16x1xf32> to vector<16x128xf32>
    %5 = arith.subf %0, %4 : vector<16x128xf32>
    %6 = math.exp %5 : vector<16x128xf32>
    %cst_3 = arith.constant dense<0.000000e+00> : vector<16xf32>
    %7 = vector.multi_reduction <add>, %6, %cst_3 [1] : vector<16x128xf32> to vector<16xf32>
    %8 = vector.shape_cast %7 : vector<16xf32> to vector<16x1xf32>
    %9 = tpu.reciprocal %8 {approx = true} : vector<16x1xf32> -> vector<16x1xf32>
    %10 = vector.broadcast %9 : vector<16x1xf32> to vector<16x128xf32>
    %11 = arith.mulf %6, %10 : vector<16x128xf32>
    %cst_4 = arith.constant 0.000000e+00 : f32
    %12 = vector.broadcast %cst_4 : f32 to vector<16x128xf32>
    %13 = arith.subf %12, %11 : vector<16x128xf32>
    %14 = math.log %1 : vector<16x128xf32>
    %15 = arith.mulf %13, %14 : vector<16x128xf32>
    %cst_5 = arith.constant 1.000000e+00 : f32
    %16 = vector.broadcast %cst_5 : f32 to vector<16x128xf32>
    %17 = arith.subf %16, %11 : vector<16x128xf32>
    %cst_6 = arith.constant 1.000000e+00 : f32
    %18 = vector.broadcast %cst_6 : f32 to vector<16x128xf32>
    %19 = arith.subf %18, %1 : vector<16x128xf32>
    %20 = math.log %19 : vector<16x128xf32>
    %21 = arith.mulf %17, %20 : vector<16x128xf32>
    %22 = arith.subf %15, %21 : vector<16x128xf32>
    %23 = vector.shape_cast %22 : vector<16x128xf32> to vector<2x8x128xf32>
    %cst_7 = arith.constant dense<0.000000e+00> : vector<8x128xf32>
    %24 = vector.multi_reduction <add>, %23, %cst_7 [0] : vector<2x8x128xf32> to vector<8x128xf32>
    %c0_i32 = arith.constant 0 : i32
    %25 = arith.cmpi eq, %arg1, %c0_i32 : i32
    %26 = arith.extui %25 : i1 to i32
    %c0_i32_8 = arith.constant 0 : i32
    %27 = arith.cmpi ne, %26, %c0_i32_8 : i32
    scf.if %27 {
      %cst_13 = arith.constant 0.000000e+00 : f32
      %31 = vector.broadcast %cst_13 : f32 to vector<8x128xf32>
      %c0_14 = arith.constant 0 : index
      %c0_15 = arith.constant 0 : index
      %32 = vector.load %arg4[%c0_14, %c0_15] : memref<8x128xf32, #tpu.memory_space<vmem>>, vector<8x128xf32>
      tpu.vector_store %arg4[%c0_14, %c0_15], %31 {strides = array<i32>} : memref<8x128xf32, #tpu.memory_space<vmem>>, vector<8x128xf32>,
    } else {
    }
    %c0_9 = arith.constant 0 : index
    %c0_10 = arith.constant 0 : index
    %28 = vector.load %arg4[%c0_9, %c0_10] : memref<8x128xf32, #tpu.memory_space<vmem>>, vector<8x128xf32>
    %29 = arith.addf %28, %24 : vector<8x128xf32>
    %c0_11 = arith.constant 0 : index
    %c0_12 = arith.constant 0 : index
    %30 = vector.load %arg4[%c0_11, %c0_12] : memref<8x128xf32, #tpu.memory_space<vmem>>, vector<8x128xf32>
    tpu.vector_store %arg4[%c0_11, %c0_12], %29 {strides = array<i32>} : memref<8x128xf32, #tpu.memory_space<vmem>>, vector<8x128xf32>,
    return
  }
  func.func @transform_0(%arg0: i32, %arg1: i32) -> (i32, i32) {
    %c1_i32 = arith.constant 1 : i32
    %0 = arith.muli %arg0, %c1_i32 : i32
    %1 = arith.addi %0, %arg1 : i32
    %c0_i32 = arith.constant 0 : i32
    %c0_i32_0 = arith.constant 0 : i32
    return %1, %c0_i32 : i32, i32
  }
  func.func @transform_1(%arg0: i32, %arg1: i32) -> (i32, i32) {
    %c1_i32 = arith.constant 1 : i32
    %0 = arith.muli %arg0, %c1_i32 : i32
    %1 = arith.addi %0, %arg1 : i32
    %c0_i32 = arith.constant 0 : i32
    %c0_i32_0 = arith.constant 0 : i32
    return %1, %c0_i32 : i32, i32
  }
  func.func @transform_2(%arg0: i32, %arg1: i32) -> (i32, i32) {
    %c0_i32 = arith.constant 0 : i32
    %c0_i32_0 = arith.constant 0 : i32
    return %arg0, %c0_i32 : i32, i32
  }
}

</mosaic_0001>

<bundles_post_ra>
// kernel: tpu_custom_call.1
= control target key start
LH: loop header
LB: loop body
LE: loop exit
PB: predicated region body
PF: predicated region fallthrough
CT: control target
= control target key end

     0   :  { %7 = vsyncpa [#allocation3], 0  ;;  %s269_s0 = inlined_call_operand.hbm [shape: f32[16,128], index: 0, kind: input, shape index: {}]   ;;  %s270_s1 = inlined_call_operand.hbm [shape: f32[16,128], index: 1, kind: input, shape index: {}]   ;;  %s271_s2 = inlined_call_operand.hbm [shape: f32[8,128], index: 2, kind: output, shape index: {}]  }
   0x1   :  { %8 = vsyncpa [#allocation6], 0 }
   0x2   :  { %9 = vsyncpa [#allocation4], 0  ;;  %s213_s9 = smov [#allocation2]   ;;  %s141_s13 = scalar_lea.hbm %s269_s0, 256 }
   0x3   :  { %s19_s10 = sshll.u32 %s213_s9, 4  ;;  %p142_p0 = scmp.ne.s32.totalorder %s269_s0, %s141_s13  ;;  %s20_s10 = int_to_ptr.vmem [resolvable:$true] %s19_s10 }
   0x4   :  { %p145_p1 = scmp.lt.u32.totalorder %s141_s13, %s269_s0 }
   0x6   :  { %p147_p2 = pnand %p145_p1, %p142_p0 }
   0x8   :  { %150 = shalt.err (!%p147_p2)
}
   0x9   :  { %s151_s18 = scalar_lea.vmem %s20_s10, 256  ;;  %p156_p4 = scmp.lt.s32.totalorder %s20_s10, %s20_s10 }
   0xa   :  { %p152_p3 = scmp.ne.s32.totalorder %s20_s10, %s151_s18  ;;  %p157_p5 = scmp.lt.s32.totalorder %s151_s18, %s151_s18 }
   0xc   :  { %p158_p6 = por %p157_p5, %p156_p4 }
   0xe   :  { %p159_p7 = pnand %p158_p6, %p152_p3 }
  0x10   :  { %162 = shalt.err (!%p159_p7)
}
  0x11   :  { %s214_s19 = smov 128   ;;  %s215_s20 = smov 8  }
  0x12   :  { %25 = dma.hbm_to_vmem [thread:$0]  %s269_s0, 256, %s20_s10, [#allocation3], %s214_s19, %s214_s19, %s215_s20  }
  0x13   :  { %s216_s23 = smov [#allocation5]   ;;  %s163_s27 = scalar_lea.hbm %s270_s1, 256 }
  0x14   :  { %s35_s24 = sshll.u32 %s216_s23, 4  ;;  %p164_p8 = scmp.ne.s32.totalorder %s270_s1, %s163_s27  ;;  %s36_s24 = int_to_ptr.vmem [resolvable:$true] %s35_s24 }
  0x15   :  { %p167_p9 = scmp.lt.u32.totalorder %s163_s27, %s270_s1 }
  0x17   :  { %p169_p10 = pnand %p167_p9, %p164_p8 }
  0x19   :  { %172 = shalt.err (!%p169_p10)
}
  0x1a   :  { %s173_s4 = scalar_lea.vmem %s36_s24, 256  ;;  %p178_p12 = scmp.lt.s32.totalorder %s36_s24, %s36_s24 }
  0x1b   :  { %p174_p11 = scmp.ne.s32.totalorder %s36_s24, %s173_s4  ;;  %p179_p13 = scmp.lt.s32.totalorder %s173_s4, %s173_s4 }
  0x1d   :  { %p180_p0 = por %p179_p13, %p178_p12 }
  0x1f   :  { %p181_p1 = pnand %p180_p0, %p174_p11 }
  0x21   :  { %184 = shalt.err (!%p181_p1)
}
  0x22   :  { %41 = dma.hbm_to_vmem [thread:$0]  %s270_s1, 256, %s36_s24, [#allocation6], %s214_s19, %s214_s19, %s215_s20  }
  0x23   :  { %207 = dma.done.wait [#allocation3], 256  }
  0x24   :  { %208 = vsyncadd [#allocation3], 4294967040 }
  0x25   :  { %209 = dma.done.wait [#allocation6], 256  }
  0x26   :  { %210 = vsyncadd [#allocation6], 4294967040  ;;  %v52_v0 = vld [vmem:[#allocation2] sm:$0xff]  ;;  %v53_v1 = vld [vmem:[#allocation2 + $0x8] sm:$0xff]  ;;  %s217_s1 = smov [#allocation7]  }
  0x27   :  { %56 = vmax.xlane.f32.xlu0 %v52_v0  ;;  %v54_v10 = vld [vmem:[#allocation5] sm:$0xff]  ;;  %v55_v11 = vld [vmem:[#allocation5 + $0x8] sm:$0xff]  ;;  %s109_s6 = sshll.u32 %s217_s1, 4  ;;  %s110_s6 = int_to_ptr.vmem [resolvable:$true] %s109_s6 }
  0x28   :  { %v84_v12 = vsub.f32 1.0, %v54_v10  ;;  %v85_v13 = vsub.f32 1.0, %v55_v11  ;;  %s185_s7 = scalar_lea.vmem %s110_s6, 128  ;;  %p190_p3 = scmp.lt.s32.totalorder %s110_s6, %s110_s6 }
  0x29   :  { %p186_p2 = scmp.ne.s32.totalorder %s110_s6, %s185_s7  ;;  %p191_p4 = scmp.lt.s32.totalorder %s185_s7, %s185_s7 }
  0x2b   :  { %58 = vmax.xlane.f32.xlu0 %v53_v1  ;;  %p192_p5 = por %p191_p4, %p190_p3 }
  0x2d   :  { %p193_p6 = pnand %p192_p5, %p186_p2 }
  0xb4   :  { %v57_v2 = vpop.xlane.xlu0 %56 }
  0xb5   :  { %v60_v3 = vsub.f32 %v52_v0, %v57_v2 }
  0xb7   :  { %v62_v4 = vmul.f32 1.442695, %v60_v3 }
  0xb8   :  { %v59_v5 = vpop.xlane.xlu0 %58 }
  0xb9   :  { %125 = vpow2.f32 %v62_v4  ;;  %v61_v6 = vsub.f32 %v53_v1, %v59_v5 }
  0xbb   :  { %v64_v7 = vmul.f32 1.442695, %v61_v6 }
  0xbd   :  { %127 = vpow2.f32 %v64_v7 }
  0xbe   :  { %129 = vlog2.f32 %v54_v10 }
  0xbf   :  { %131 = vlog2.f32 %v84_v12 }
  0xc3   :  { %v126_v8 = vpop.eup %125 }
  0xc4   :  { %66 = vadd.xlane.f32.xlu1 %v126_v8 }
  0xc7   :  { %v128_v9 = vpop.eup %127 }
  0xc8   :  { %68 = vadd.xlane.f32.xlu1 %v128_v9  ;;  %v130_v16 = vpop.eup %129 }
  0xc9   :  { %v132_v17 = vpop.eup %131  ;;  %v77_v24 = vmul.f32 0.6931472, %v130_v16 }
  0xca   :  { %v87_v25 = vmul.f32 0.6931472, %v132_v17 }
 0x151   :  { %v67_v14 = vpop.xlane.xlu1 %66 }
 0x152   :  { %133 = vrcp.f32 %v67_v14 }
 0x153   :  { %135 = vlog2.f32 %v55_v11 }
 0x154   :  { %137 = vlog2.f32 %v85_v13 }
 0x155   :  { %v69_v15 = vpop.xlane.xlu1 %68 }
 0x156   :  { %139 = vrcp.f32 %v69_v15 }
 0x15c   :  { %v134_v18 = vpop.eup %133 }
 0x15d   :  { %v136_v19 = vpop.eup %135  ;;  %v72_v20 = vmul.f32 %v134_v18, %v126_v8 }
 0x15e   :  { %v138_v21 = vpop.eup %137  ;;  %v79_v28 = vmul.f32 0.6931472, %v136_v19 }
 0x15f   :  { %v74_v22 = vsub.f32 0.0, %v72_v20  ;;  %v82_v23 = vsub.f32 1.0, %v72_v20  ;;  %v89_v29 = vmul.f32 0.6931472, %v138_v21 }
 0x160   :  { %v140_v26 = vpop.eup %139 }
 0x161   :  { %v73_v27 = vmul.f32 %v140_v26, %v128_v9  ;;  %v80_v32 = vmul.f32 %v77_v24, %v74_v22  ;;  %v90_v33 = vmul.f32 %v87_v25, %v82_v23 }
 0x163   :  { %v75_v30 = vsub.f32 0.0, %v73_v27  ;;  %v83_v31 = vsub.f32 1.0, %v73_v27  ;;  %v92_v36 = vsub.f32 %v80_v32, %v90_v33 }
 0x165   :  { %v81_v34 = vmul.f32 %v79_v28, %v75_v30  ;;  %v91_v35 = vmul.f32 %v89_v29, %v83_v31 }
 0x167   :  { %v93_v37 = vsub.f32 %v81_v34, %v91_v35 }
 0x169   :  { %v94_v38 = vadd.f32 %v93_v37, %v92_v36 }
 0x16b   :  { %102 = vst [vmem:[#allocation7] sm:$0xff] %v94_v38 }
 0x16c   :  { %196 = shalt.err (!%p193_p6)
}
 0x16d   :  { %s197_s10 = scalar_lea.hbm %s271_s2, 128 }
 0x16e   :  { %p198_p7 = scmp.ne.s32.totalorder %s271_s2, %s197_s10  ;;  %p201_p8 = scmp.lt.u32.totalorder %s197_s10, %s271_s2 }
 0x170   :  { %p203_p9 = pnand %p201_p8, %p198_p7 }
 0x172   :  { %206 = shalt.err (!%p203_p9)
}
 0x173   :  { %112 = dma.vmem_to_hbm [thread:$0]  %s110_s6, 128, %s271_s2, [#allocation4]  }
 0x174   :  { %211 = dma.done.wait [#allocation4], 128  }
 0x175   :  { %212 = vsyncadd [#allocation4], 4294967168 }
 0x176   :  { %116 = vsyncpa [#allocation3], 1 }
 0x177   :  { %117 = vsyncpa [#allocation6], 1 }
 0x178   :  { %118 = vsyncpa [#allocation4], 1 }

</bundles_post_ra>
